<compile_context>
chip_gen: v7x
topology: tpu7x:2x2x1
jax: 0.10.0
libtpu: 0.0.40
codegen_flags: <defaults>
</compile_context>

<pallas_src>
import math
import functools

import jax
import jax.numpy as jnp
from jax.experimental import pallas as pl
from jax.experimental.pallas import tpu as pltpu


_MiB = 1024 * 1024
_MAX_TQ = 512            # largest q tile (rows) per grid step
_MAX_FUSED_ROWS = 1024   # cap on heads_per_block * tq


# --------------------------------------------------------------------------------------
# Hardware queries (defensive: fall back to conservative defaults)
# --------------------------------------------------------------------------------------
def _vmem_capacity_bytes():
    try:
        info = pltpu.get_tpu_info()
        cap = getattr(info, "vmem_capacity_bytes", None)
        if cap:
            return int(cap)
    except Exception:
        pass
    try:
        kind = jax.devices()[0].device_kind.lower()
        if "v7" in kind:
            return 64 * _MiB
        if "v5" in kind or "v6" in kind:
            return 128 * _MiB
    except Exception:
        pass
    return 64 * _MiB      # smallest generation (v7x) -> always safe


def _has_bf16_vector_units():
    # bf16 VPU/EUP exists on v6e/v7x; v5e (and older) do exp in f32.
    try:
        kind = jax.devices()[0].device_kind.lower()
    except Exception:
        return False
    for old in ("v2", "v3", "v4", "v5"):
        if old in kind:
            return False
    return "tpu" in kind


# --------------------------------------------------------------------------------------
# Kernels
# --------------------------------------------------------------------------------------
def _attend(q_ref, k_ref, v_ref, mask_ref, out_ref, attn_ref, *,
            scale, mm_dtype, exp_dtype):
    # Block shapes: q (1,HB,TQ,d_k)  k (1,HB,d_k,S)  v (1,HB,S,d_v)
    q = q_ref[0]
    k = k_ref[0]
    v = v_ref[0]

    # Fold 1/sqrt(d_k) into q (TQ*d_k VPU work, not TQ*S), then feed the MXU in its
    # native matmul dtype (bf16 in "fast" mode) with f32 accumulation.
    q_mm = (q.astype(jnp.float32) * scale).astype(mm_dtype)
    k_mm = k.astype(mm_dtype)

    s = jnp.einsum("hqd,hds->hqs", q_mm, k_mm, preferred_element_type=jnp.float32)

    if mask_ref is not None:
        # Additive mask (bool masks were pre-converted to 0 / -inf in the wrapper),
        # kept in its broadcastable shape (mh_b, mq_b, ms) with size-1 broadcast dims.
        s = s + mask_ref[0].astype(jnp.float32)

    # Numerically-stable softmax over the key axis.
    row_max = jnp.max(s, axis=-1, keepdims=True)
    e = jnp.exp((s - row_max).astype(exp_dtype))        # EUP; bf16 where supported
    denom = jnp.sum(e.astype(jnp.float32), axis=-1, keepdims=True)
    # Approx reciprocal on the (otherwise idle) EUP slot, refined by one Newton step
    # over the tiny (h, tq, 1) column -> weights sum to 1 at ~f32 accuracy for free.
    r = pl.reciprocal(denom, approx=True)
    r = r * (2.0 - denom * r)
    w = e.astype(jnp.float32) * r

    attn_ref[0] = w.astype(attn_ref.dtype)

    out = jnp.einsum("hqs,hsd->hqd", w.astype(mm_dtype), v.astype(mm_dtype),
                     preferred_element_type=jnp.float32)
    out_ref[0] = out.astype(out_ref.dtype)


def _sdpa_kernel(q_ref, k_ref, v_ref, out_ref, attn_ref, *,
                 scale, mm_dtype, exp_dtype):
    _attend(q_ref, k_ref, v_ref, None, out_ref, attn_ref,
            scale=scale, mm_dtype=mm_dtype, exp_dtype=exp_dtype)


def _sdpa_kernel_masked(q_ref, k_ref, v_ref, mask_ref, out_ref, attn_ref, *,
                        scale, mm_dtype, exp_dtype):
    _attend(q_ref, k_ref, v_ref, mask_ref, out_ref, attn_ref,
            scale=scale, mm_dtype=mm_dtype, exp_dtype=exp_dtype)


# --------------------------------------------------------------------------------------
# Tiling heuristic
# --------------------------------------------------------------------------------------
def _choose_tiling(n_heads, q_len, seq_len, d_k, d_v,
                   in_itemsize, out_itemsize, mask_shape, budget_bytes, tq_gran):
    """Pick (heads_per_block, q_tile) maximizing work per grid step within VMEM."""
    if mask_shape is not None:
        _, mh, mq, ms = mask_shape

    def ws_bytes(hb, tq):
        # Double-buffered BlockSpec windows.
        inp = hb * (tq * d_k + d_k * seq_len + seq_len * d_v) * in_itemsize
        out = hb * (tq * d_v + tq * seq_len) * out_itemsize
        msk = 0
        if mask_shape is not None:
            msk = ((hb if mh == n_heads else 1)
                   * (tq if mq == q_len else 1)
                   * ms * 4)                      # mask transported as f32
        dbuf = 2 * (inp + out + msk)
        # In-kernel intermediates (scores/exp/weights slabs) + Mosaic scratch headroom:
        # conservatively ~3x the (hb, tq, S) f32 slab.
        slabs = 3 * hb * tq * seq_len * 4
        return dbuf + slabs

    # ---- q tile: full q_len when small, else up to _MAX_TQ, shrunk to fit budget ----
    tq = q_len if q_len <= _MAX_TQ else _MAX_TQ
    while ws_bytes(1, tq) > budget_bytes and tq > tq_gran:
        if tq == q_len:
            tq = max(tq_gran, (q_len // 2 // tq_gran) * tq_gran)
        else:
            tq = max(tq_gran, (tq // 2 // tq_gran) * tq_gran)

    # ---- head fusion (default, not just small-q): amortize per-step overhead ----
    hb = 1
    for cand in range(n_heads, 1, -1):
        if n_heads % cand:
            continue
        if cand * tq > _MAX_FUSED_ROWS:
            continue
        if ws_bytes(cand, tq) <= budget_bytes:
            hb = cand
            break
    return hb, tq


# --------------------------------------------------------------------------------------
# Wrapper
# --------------------------------------------------------------------------------------
def scaled_dot_product_attention(q, k, v, attn_mask=None, *, precision="fast"):
    """q: (bs,H,q_len,d_k), k: (bs,H,d_k,seq_len), v: (bs,H,seq_len,d_v).

    attn_mask (optional) must be broadcastable to (bs,H,q_len,seq_len); bool means
    "True = masked out" (score -> -inf), any float dtype is added to the scores.
    precision: "fast" -> bf16 MXU matmuls (f32 accumulation) and bf16 exp where the
    chip supports it; "high" -> f32 everywhere.
    """
    assert precision in ("fast", "high")
    bs, n_heads, q_len, d_k = q.shape
    seq_len = k.shape[-1]
    d_v = v.shape[-1]
    scale = 1.0 / math.sqrt(d_k)
    out_dtype = q.dtype

    if precision == "fast":
        mm_dtype = jnp.bfloat16
        exp_dtype = jnp.bfloat16 if _has_bf16_vector_units() else jnp.float32
    else:
        mm_dtype = jnp.float32
        exp_dtype = jnp.float32

    # ---- mask: keep its broadcastable shape; bool -> additive 0 / -inf (f32) ----
    mask4 = None
    if attn_mask is not None:
        mask4 = attn_mask
        if mask4.ndim < 4:
            mask4 = mask4.reshape((1,) * (4 - mask4.ndim) + mask4.shape)
        if mask4.dtype == jnp.bool_:
            mask4 = jnp.where(mask4, -jnp.inf, 0.0).astype(jnp.float32)
        else:
            mask4 = mask4.astype(jnp.float32)
        mb, mh, mq, ms = mask4.shape
        assert (mb in (1, bs) and mh in (1, n_heads)
                and mq in (1, q_len) and ms in (1, seq_len)), \
            "attn_mask must be broadcastable to (bs, n_heads, q_len, seq_len)"

    # ---- per-generation VMEM budget & tiling ----
    in_itemsize = jnp.dtype(q.dtype).itemsize
    out_itemsize = jnp.dtype(out_dtype).itemsize
    cap = _vmem_capacity_bytes()
    vmem_limit = int(min(cap - 16 * _MiB, int(cap * 0.85)))   # ~108 MiB v5e/v6e, 48 MiB v7x
    budget = vmem_limit - 8 * _MiB                            # headroom for misc scratch
    tq_gran = 16 if in_itemsize < 4 else 8                    # bf16 sublane packing

    hb, tq = _choose_tiling(
        n_heads, q_len, seq_len, d_k, d_v, in_itemsize, out_itemsize,
        None if mask4 is None else mask4.shape, budget, tq_gran)

    # q-tile axis innermost: K/V block index does not change between consecutive steps,
    # so Pallas keeps the K/V blocks resident instead of re-DMA'ing them.
    grid = (bs, n_heads // hb, pl.cdiv(q_len, tq))

    qo_idx = lambda b, h, qi: (b, h, qi, 0)
    kv_idx = lambda b, h, qi: (b, h, 0, 0)

    q_spec = pl.BlockSpec((1, hb, tq, d_k), qo_idx)
    k_spec = pl.BlockSpec((1, hb, d_k, seq_len), kv_idx)
    v_spec = pl.BlockSpec((1, hb, seq_len, d_v), kv_idx)
    out_spec = pl.BlockSpec((1, hb, tq, d_v), qo_idx)
    attn_spec = pl.BlockSpec((1, hb, tq, seq_len), qo_idx)   # lane-dense (last dim = S)

    out_shapes = (
        jax.ShapeDtypeStruct((bs, n_heads, q_len, d_v), out_dtype),
        jax.ShapeDtypeStruct((bs, n_heads, q_len, seq_len), out_dtype),
    )

    # Inner q-tile axis is "arbitrary": megacore (v7x) shards over batch/heads, so each
    # core keeps its K/V blocks resident instead of both cores re-fetching them.
    cp = pltpu.CompilerParams(
        dimension_semantics=("parallel", "parallel", "arbitrary"),
        vmem_limit_bytes=vmem_limit,
    )

    if mask4 is None:
        kernel = functools.partial(_sdpa_kernel, scale=scale,
                                   mm_dtype=mm_dtype, exp_dtype=exp_dtype)
        return pl.pallas_call(
            kernel,
            out_shape=out_shapes,
            grid=grid,
            in_specs=[q_spec, k_spec, v_spec],
            out_specs=(out_spec, attn_spec),
            compiler_params=cp,
        )(q, k, v)

    # Mask stays in its original broadcastable shape: broadcast dims use a size-1 block
    # that always maps to block 0 (no HBM blow-up, no per-head replication).
    mb, mh, mq, ms = mask4.shape
    m_blk = (1, hb if mh == n_heads else 1, tq if mq == q_len else 1, ms)

    def mask_idx(b, h, qi):
        return (b if mb == bs else 0,
                h if mh == n_heads else 0,
                qi if mq == q_len else 0,
                0)

    mask_spec = pl.BlockSpec(m_blk, mask_idx)
    kernel = functools.partial(_sdpa_kernel_masked, scale=scale,
                               mm_dtype=mm_dtype, exp_dtype=exp_dtype)
    return pl.pallas_call(
        kernel,
        out_shape=out_shapes,
        grid=grid,
        in_specs=[q_spec, k_spec, v_spec, mask_spec],
        out_specs=(out_spec, attn_spec),
        compiler_params=cp,
    )(q, k, v, mask4)


# --------------------------------------------------------------------------------------
# Pure-JAX reference
# --------------------------------------------------------------------------------------
def _reference(q, k, v, attn_mask=None):
    d_k = q.shape[-1]
    s = jnp.einsum("bhqd,bhds->bhqs", q, k,
                   precision=jax.lax.Precision.HIGHEST) / math.sqrt(d_k)
    if attn_mask is not None:
        if attn_mask.dtype == jnp.bool_:
            s = jnp.where(attn_mask, -jnp.inf, s)
        else:
            s = s + attn_mask
    w = jax.nn.softmax(s, axis=-1)
    o = jnp.einsum("bhqs,bhsd->bhqd", w, v, precision=jax.lax.Precision.HIGHEST)
    return o, w


if __name__ == "__main__":
    key = jax.random.PRNGKey(0)
    bs, n_heads, q_len, seq_len, d_k, d_v = 2, 4, 8, 8, 32, 32

    kq, kk, kv = jax.random.split(key, 3)
    q = jax.random.normal(kq, (bs, n_heads, q_len, d_k), dtype=jnp.float32)
    k = jax.random.normal(kk, (bs, n_heads, d_k, seq_len), dtype=jnp.float32)
    v = jax.random.normal(kv, (bs, n_heads, seq_len, d_v), dtype=jnp.float32)

    # ---- high-precision path (f32 matmuls / f32 exp), unmasked: tight tolerance ----
    out, attn = scaled_dot_product_attention(q, k, v, precision="high")
    out, attn = jax.block_until_ready((out, attn))
    ref_out, ref_attn = _reference(q, k, v)
    assert jnp.allclose(out, ref_out, atol=2e-3, rtol=2e-3)
    assert jnp.allclose(attn, ref_attn, atol=2e-3, rtol=2e-3)

    # ---- default fast path (bf16 MXU), bool causal mask broadcast as (1,1,q,s) ----
    rows = jnp.arange(q_len)[:, None]
    cols = jnp.arange(seq_len)[None, :]
    causal = (cols > rows)[None, None]   # True = masked out; no fully-masked rows
    m_out, m_attn = scaled_dot_product_attention(q, k, v, attn_mask=causal)
    m_out, m_attn = jax.block_until_ready((m_out, m_attn))
    ref_mo, ref_ma = _reference(q, k, v, attn_mask=causal)
    # tolerance accounts for bf16 operands in the QK / PV matmuls (f32 accumulation)
    assert jnp.allclose(m_out, ref_mo, atol=6e-2, rtol=6e-2)
    assert jnp.allclose(m_attn, ref_ma, atol=6e-2, rtol=6e-2)

    print("KERNEL_OK")
</pallas_src>

<mosaic_0001>
module attributes {stable_mosaic.version = 11 : i64} {
  func.func @_sdpa_kernel(%arg0: i32, %arg1: i32, %arg2: i32, %arg3: memref<1x4x8x32xf32, #tpu.memory_space<vmem>>, %arg4: memref<1x4x32x8xf32, #tpu.memory_space<vmem>>, %arg5: memref<1x4x8x32xf32, #tpu.memory_space<vmem>>, %arg6: memref<1x4x8x32xf32, #tpu.memory_space<vmem>>, %arg7: memref<1x4x8x8xf32, #tpu.memory_space<vmem>>) attributes {dimension_semantics = [#tpu.dimension_semantics<parallel>, #tpu.dimension_semantics<parallel>, #tpu.dimension_semantics<arbitrary>], iteration_bounds = array<i64: 2, 1, 1>, scalar_prefetch = 0 : i64, scratch_operands = 0 : i64, tpu.core_type = #tpu.core_type<tc>, window_params = [{transform_indices = @transform_0, window_bounds = array<i64: 1, 4, 8, 32>}, {transform_indices = @transform_1, window_bounds = array<i64: 1, 4, 32, 8>}, {transform_indices = @transform_2, window_bounds = array<i64: 1, 4, 8, 32>}, {transform_indices = @transform_3, window_bounds = array<i64: 1, 4, 8, 32>}, {transform_indices = @transform_4, window_bounds = array<i64: 1, 4, 8, 8>}]} {
    %c0 = arith.constant 0 : index
    %c0_0 = arith.constant 0 : index
    %c0_1 = arith.constant 0 : index
    %c0_2 = arith.constant 0 : index
    %0 = vector.load %arg3[%c0, %c0_0, %c0_1, %c0_2] : memref<1x4x8x32xf32, #tpu.memory_space<vmem>>, vector<1x4x8x32xf32>
    %1 = vector.shape_cast %0 : vector<1x4x8x32xf32> to vector<4x8x32xf32>
    %c0_3 = arith.constant 0 : index
    %c0_4 = arith.constant 0 : index
    %c0_5 = arith.constant 0 : index
    %c0_6 = arith.constant 0 : index
    %2 = vector.load %arg4[%c0_3, %c0_4, %c0_5, %c0_6] : memref<1x4x32x8xf32, #tpu.memory_space<vmem>>, vector<1x4x32x8xf32>
    %3 = vector.shape_cast %2 : vector<1x4x32x8xf32> to vector<4x32x8xf32>
    %c0_7 = arith.constant 0 : index
    %c0_8 = arith.constant 0 : index
    %c0_9 = arith.constant 0 : index
    %c0_10 = arith.constant 0 : index
    %4 = vector.load %arg5[%c0_7, %c0_8, %c0_9, %c0_10] : memref<1x4x8x32xf32, #tpu.memory_space<vmem>>, vector<1x4x8x32xf32>
    %5 = vector.shape_cast %4 : vector<1x4x8x32xf32> to vector<4x8x32xf32>
    %cst = arith.constant 0.176776692 : f32
    %6 = vector.broadcast %cst : f32 to vector<4x8x32xf32>
    %7 = arith.mulf %1, %6 : vector<4x8x32xf32>
    "tpu.trace_start"() <{level = 10 : i32, message = "hqd,hds->hqs"}> : () -> ()
    %cst_11 = arith.constant dense<0.000000e+00> : vector<4x8x8xf32>
    %8 = tpu.matmul %7, %3, %cst_11 {dimension_numbers = #tpu.dot_dimension_numbers<[2], [1], [1], [2], [0, 0, 0, 1, 1, 2], [0], [0]>} : vector<4x8x32xf32>, vector<4x32x8xf32>, vector<4x8x8xf32> -> vector<4x8x8xf32>
    "tpu.trace_stop"() : () -> ()
    %cst_12 = arith.constant dense<0xFF800000> : vector<4x8xf32>
    %9 = vector.multi_reduction <maximumf>, %8, %cst_12 [2] : vector<4x8x8xf32> to vector<4x8xf32>
    %10 = vector.shape_cast %9 : vector<4x8xf32> to vector<4x8x1xf32>
    %11 = vector.broadcast %10 : vector<4x8x1xf32> to vector<4x8x8xf32>
    %12 = arith.subf %8, %11 : vector<4x8x8xf32>
    %13 = math.exp %12 : vector<4x8x8xf32>
    %cst_13 = arith.constant dense<0.000000e+00> : vector<4x8xf32>
    %14 = vector.multi_reduction <add>, %13, %cst_13 [2] : vector<4x8x8xf32> to vector<4x8xf32>
    %15 = vector.shape_cast %14 : vector<4x8xf32> to vector<4x8x1xf32>
    %16 = tpu.reciprocal %15 {approx = true} : vector<4x8x1xf32> -> vector<4x8x1xf32>
    %17 = arith.mulf %15, %16 : vector<4x8x1xf32>
    %cst_14 = arith.constant 2.000000e+00 : f32
    %18 = vector.broadcast %cst_14 : f32 to vector<4x8x1xf32>
    %19 = arith.subf %18, %17 : vector<4x8x1xf32>
    %20 = arith.mulf %16, %19 : vector<4x8x1xf32>
    %21 = vector.broadcast %20 : vector<4x8x1xf32> to vector<4x8x8xf32>
    %22 = arith.mulf %13, %21 : vector<4x8x8xf32>
    %c0_15 = arith.constant 0 : index
    %c0_16 = arith.constant 0 : index
    %c0_17 = arith.constant 0 : index
    %c0_18 = arith.constant 0 : index
    %23 = vector.load %arg7[%c0_15, %c0_16, %c0_17, %c0_18] : memref<1x4x8x8xf32, #tpu.memory_space<vmem>>, vector<1x4x8x8xf32>
    %24 = vector.shape_cast %23 : vector<1x4x8x8xf32> to vector<4x8x8xf32>
    %25 = vector.shape_cast %22 : vector<4x8x8xf32> to vector<1x4x8x8xf32>
    tpu.vector_store %arg7[%c0_15, %c0_16, %c0_17, %c0_18], %25 {strides = array<i32>} : memref<1x4x8x8xf32, #tpu.memory_space<vmem>>, vector<1x4x8x8xf32>,
    "tpu.trace_start"() <{level = 10 : i32, message = "hqs,hsd->hqd"}> : () -> ()
    %cst_19 = arith.constant dense<0.000000e+00> : vector<4x8x32xf32>
    %26 = tpu.matmul %22, %5, %cst_19 {dimension_numbers = #tpu.dot_dimension_numbers<[2], [1], [1], [2], [0, 0, 0, 1, 1, 2], [0], [0]>} : vector<4x8x8xf32>, vector<4x8x32xf32>, vector<4x8x32xf32> -> vector<4x8x32xf32>
    "tpu.trace_stop"() : () -> ()
    %c0_20 = arith.constant 0 : index
    %c0_21 = arith.constant 0 : index
    %c0_22 = arith.constant 0 : index
    %c0_23 = arith.constant 0 : index
    %27 = vector.load %arg6[%c0_20, %c0_21, %c0_22, %c0_23] : memref<1x4x8x32xf32, #tpu.memory_space<vmem>>, vector<1x4x8x32xf32>
    %28 = vector.shape_cast %27 : vector<1x4x8x32xf32> to vector<4x8x32xf32>
    %29 = vector.shape_cast %26 : vector<4x8x32xf32> to vector<1x4x8x32xf32>
    tpu.vector_store %arg6[%c0_20, %c0_21, %c0_22, %c0_23], %29 {strides = array<i32>} : memref<1x4x8x32xf32, #tpu.memory_space<vmem>>, vector<1x4x8x32xf32>,
    return
  }
  func.func @transform_0(%arg0: i32, %arg1: i32, %arg2: i32) -> (i32, i32, i32, i32) {
    %c0_i32 = arith.constant 0 : i32
    %c0_i32_0 = arith.constant 0 : i32
    return %arg0, %arg1, %arg2, %c0_i32 : i32, i32, i32, i32
  }
  func.func @transform_1(%arg0: i32, %arg1: i32, %arg2: i32) -> (i32, i32, i32, i32) {
    %c0_i32 = arith.constant 0 : i32
    %c0_i32_0 = arith.constant 0 : i32
    %c0_i32_1 = arith.constant 0 : i32
    return %arg0, %arg1, %c0_i32, %c0_i32_0 : i32, i32, i32, i32
  }
  func.func @transform_2(%arg0: i32, %arg1: i32, %arg2: i32) -> (i32, i32, i32, i32) {
    %c0_i32 = arith.constant 0 : i32
    %c0_i32_0 = arith.constant 0 : i32
    %c0_i32_1 = arith.constant 0 : i32
    return %arg0, %arg1, %c0_i32, %c0_i32_0 : i32, i32, i32, i32
  }
  func.func @transform_3(%arg0: i32, %arg1: i32, %arg2: i32) -> (i32, i32, i32, i32) {
    %c0_i32 = arith.constant 0 : i32
    %c0_i32_0 = arith.constant 0 : i32
    return %arg0, %arg1, %arg2, %c0_i32 : i32, i32, i32, i32
  }
  func.func @transform_4(%arg0: i32, %arg1: i32, %arg2: i32) -> (i32, i32, i32, i32) {
    %c0_i32 = arith.constant 0 : i32
    %c0_i32_0 = arith.constant 0 : i32
    return %arg0, %arg1, %arg2, %c0_i32 : i32, i32, i32, i32
  }
}

</mosaic_0001>

<bundles_post_ra>
// kernel: tpu_custom_call.1
= control target key start
LH: loop header
LB: loop body
LE: loop exit
PB: predicated region body
PF: predicated region fallthrough
CT: control target
= control target key end

     0   :  { %10 = vsyncpa [#allocation3], 0  ;;  %s1844_s0 = inlined_call_operand.vmem [shape: f32[2,4,8,32], index: 0, kind: input, shape index: {}]   ;;  %s1845_s1 = inlined_call_operand.vmem [shape: f32[2,4,32,8], index: 1, kind: input, shape index: {}]   ;;  %s1846_s2 = inlined_call_operand.vmem [shape: f32[2,4,8,32], index: 2, kind: input, shape index: {}]   ;;  %s1847_s3 = inlined_call_operand.hbm [shape: f32[2,4,8,32], index: 3, kind: output, shape index: {0}]   ;;  %s1848_s4 = inlined_call_operand.hbm [shape: f32[2,4,8,8], index: 4, kind: output, shape index: {1}]  }
   0x1   :  { %12 = vsyncpa [#allocation3 + $0x1], 0 }
   0x2   :  { %13 = vsyncpa [#allocation5], 0 }
   0x3   :  { %15 = vsyncpa [#allocation5 + $0x1], 0  ;;  %s1593_s15 = smov 0   ;;  %s1595_s16 = smov 0  }
   0x4   :  { %s1597_s17 = smov 0   ;;  %s1599_s18 = smov 0  }
   0x5   :  { %s1601_s19 = smov 0   ;;  %s1603_s20 = smov 0  }
   0x6 LB: > { %s1218_s21 = sadd.s32 4294967295, %s1559_s20   ;;  %s1219_s22 = sadd.s32 4294967294, %s1559_s20   ;;  %s1559_s20 = sphi %s1603_s20, %s21_s20   ;;  %s1555_s19 = sphi %s1601_s19, %s1855_s19   ;;  %s1551_s18 = sphi %s1599_s18, %s1854_s18   ;;  %s1547_s17 = sphi %s1597_s17, %s1853_s17   ;;  %s1543_s16 = sphi %s1595_s16, %s1852_s16   ;;  %s1539_s15 = sphi %s1593_s15, %s1851_s15  }
   0x7   : > { %s40_s23 = sadd.s32 1, %s1555_s19  ;;  %s137_s24 = sadd.s32 1, %s1547_s17 }
   0x8   : > { %p42_p0 = scmp.ge.s32.totalorder %s40_s23, 2  ;;  %p147_p1 = scmp.ne.s32.totalorder %s1547_s17, %s1543_s16 }
   0x9   : > { %p148_p2 = scmp.eq.s32.totalorder %s1218_s21, 1  ;;  %p153_p3 = scmp.ne.s32.totalorder %s1543_s16, %s1539_s15 }
   0xa   : > { %s1857_s23 = smov (%p42_p0, %s40_s23), 0  ;;  %p154_p5 = scmp.eq.s32.totalorder %s1219_s22, 1 }
   0xb   : > { %p1633_p4 = por %p148_p2, %p147_p1  ;;  %s130_s26 = ssub.s32 %s1555_s19, %s1857_s23 }
   0xc   : > { %p1222_p6 = scmp.ge.s32.totalorder %s1559_s20, 1  ;;  %p135_p7 = scmp.eq.s32.totalorder %s130_s26, 0 }
   0xd   : > { %p1640_p8 = por %p154_p5, %p153_p3  ;;  %p245_p9 = scmp.lt.s32.totalorder %s1559_s20, 3 }
   0xe   : > { %s1646_s28 = scalar_select %p135_p7, %s1547_s17, %s137_s24  }
   0xf   : > { %p246_p10 = pnand %p1222_p6, %p245_p9 }
  0x10   : > { %p303_p11 = scmp.lt.s32.totalorder (!%p246_p10), %s1551_s18, 1  ;;  %v1561_v0 = vmov (!%p246_p10), 0.0|0.0   ;;  %vm1562_vm0 = vmmov (!%p246_p10), 0   ;;  %v1563_v1 = vmov (!%p246_p10), 0.0   ;;  %vm366_vm1 = vcmask (!%p246_p10), 261120   ;;  %s1724_s21 = sand.u32 (!%p246_p10), 1, %s1543_s16  }
  0x11   : > { %249 = sbr.rel (%p246_p10) target bundleno = 808 (0x328), region = 32  ;;  %1344 = vmatprep.subr.bf16.mxu0 (!%p246_p10), %v1561_v0  ;;  %1350 = vmatprep.subr.bf16.mxu1 (!%p246_p10), %v1561_v0  ;;  %vm659_vm2 = vcmask (!%p246_p10), 64512   ;;  %s1223_s22 = sshll.u32 (!%p246_p10), %s1724_s21, 5 }
  0x12   : > { %1288 = vmatprep.mubr.msk.f32.mxu0 (!%p246_p10), %vm1562_vm0, %v1563_v1  ;;  %1299 = vmatprep.mubr.msk.f32.mxu1 (!%p246_p10), %vm1562_vm0, %v1563_v1  ;;  %s301_s24 = scalar_lea.vmem (!%p246_p10), [#allocation4], %s1223_s22  ;;  %s1022_s7 = scalar_lea.sflag (!%p246_p10), [#allocation5], %s1724_s21 }
  0x13   : > { %s1057_s26 = sshll.u32 (!%p246_p10), %s301_s24, 4  ;;  %s1564_s9 = smov (!%p246_p10), [#allocation4]   ;;  %s1743_s26 = int_to_ptr.vmem [resolvable:$true] %s1057_s26 }
  0x14   : > { %s1453_s10 = sshll.u32 (!%p246_p10), %s1564_s9, 4  ;;  %s1454_s10 = int_to_ptr.vmem [resolvable:$false] %s1453_s10 }
  0x15   : > { %p1456_p1 = scmp.lt.s32.totalorder (!%p246_p10), %s1743_s26, %s1454_s10 }
  0x18   : > { %s1650_s29 = scalar_select %p303_p11, %s1551_s18, 1 }
  0x1a   : > { %s1248_s30 = sshll.u32 %s1650_s29, 7  ;;  %s1247_s5 = sshll.u32 %s1650_s29, 5 }
  0x1b   : > { %s1661_s8 = scalar_lea.vmem %s1845_s1, %s1248_s30  ;;  %s1671_s11 = scalar_lea.vmem %s1844_s0, %s1247_s5 }
  0x1c   : > { %v342_v2 = vld [vmem:[%s1661_s8] sm:$0xff]  ;;  %v343_v3 = vld [vmem:[%s1661_s8 + $0x8] sm:$0xff]  ;;  %v344_v7 = vld [vmem:[%s1661_s8 + $0x10] sm:$0xff]  ;;  %s1717_s14 = scalar_lea.vmem %s1846_s2, %s1247_s5  ;;  %s1250_s29 = sshll.u32 %s1551_s18, 9 }
  0x1d   : > { %v346_v4 = vld [vmem:[%s1661_s8 + $0x20] sm:$0xff]  ;;  %v1345_v5 = vpack.c.bf16 %v343_v3, %v342_v2  ;;  %v347_v6 = vld [vmem:[%s1661_s8 + $0x28] sm:$0xff]  ;;  %v345_v8 = vld [vmem:[%s1661_s8 + $0x18] sm:$0xff]  ;;  %s1751_s6 = scalar_lea.hbm %s1848_s4, %s1250_s29 }
  0x1e   : > { %v1351_v9 = vpack.c.bf16 %v347_v6, %v346_v4  ;;  %v348_v10 = vld [vmem:[%s1661_s8 + $0x30] sm:$0xff]  ;;  %v349_v11 = vld [vmem:[%s1661_s8 + $0x38] sm:$0xff]  ;;  %v1348_v12 = vpack.c.bf16 %v345_v8, %v344_v7  ;;  %v338_v13 = vld [vmem:[%s1671_s11] sm:$0xff] }
  0x1f   : > { %1346 = vmatpush3.bf16.msra.mxu0 %v1345_v5  ;;  %v1354_v14 = vpack.c.bf16 %v349_v11, %v348_v10  ;;  %v350_v15 = vld [vmem:[%s1661_s8 + $0x40] sm:$0xff]  ;;  %v351_v16 = vld [vmem:[%s1661_s8 + $0x48] sm:$0xff]  ;;  %v362_v20 = vmul.f32 0.17677669, %v338_v13  ;;  %v352_v24 = vld [vmem:[%s1661_s8 + $0x50] sm:$0xff] }
  0x20   : > { %1347 = vmatprep.subr.bf16.mxu0 %v1561_v0  ;;  %1352 = vmatpush3.bf16.msra.mxu1 %v1351_v9  ;;  %v339_v17 = vld [vmem:[%s1671_s11 + $0x8] sm:$0xff]  ;;  %v354_v18 = vld [vmem:[%s1661_s8 + $0x60] sm:$0xff]  ;;  %v1357_v21 = vpack.c.bf16 %v351_v16, %v350_v15  ;;  %v353_v25 = vld [vmem:[%s1661_s8 + $0x58] sm:$0xff] }
  0x21   : > { %1353 = vmatprep.subr.bf16.mxu1 %v1561_v0  ;;  %v355_v19 = vld [vmem:[%s1661_s8 + $0x68] sm:$0xff]  ;;  %v363_v22 = vmul.f32 0.17677669, %v339_v17  ;;  %v356_v26 = vld [vmem:[%s1661_s8 + $0x70] sm:$0xff]  ;;  %v357_v27 = vld [vmem:[%s1661_s8 + $0x78] sm:$0xff]  ;;  %v1360_v28 = vpack.c.bf16 %v353_v25, %v352_v24  ;;  %s1449_s8 = scalar_lea.vmem %s1743_s26, 512 }
  0x22   : > { %v1363_v23 = vpack.c.bf16 %v355_v19, %v354_v18  ;;  %v340_v29 = vld [vmem:[%s1671_s11 + $0x10] sm:$0xff]  ;;  %v1366_v30 = vpack.c.bf16 %v357_v27, %v356_v26  ;;  %v341_v31 = vld [vmem:[%s1671_s11 + $0x18] sm:$0xff]  ;;  %v358_v3 = vld [vmem:[%s1717_s14] sm:$0xff]  ;;  %p1450_p12 = scmp.ne.s32.totalorder %s1743_s26, %s1449_s8  ;;  %s1455_s11 = scalar_lea.vmem %s1454_s10, 1024 }
  0x23   : > { %1349 = vmatpush3.bf16.msra.mxu0 %v1348_v12  ;;  %v364_v32 = vmul.f32 0.17677669, %v340_v29  ;;  %v365_v33 = vmul.f32 0.17677669, %v341_v31  ;;  %v359_v4 = vld [vmem:[%s1717_s14 + $0x8] sm:$0xff]  ;;  %v360_v17 = vld [vmem:[%s1717_s14 + $0x10] sm:$0xff]  ;;  %p1457_p2 = scmp.lt.s32.totalorder %s1455_s11, %s1449_s8 }
  0x24   : > { %1355 = vmatpush3.bf16.msra.mxu1 %v1354_v14  ;;  %1356 = vmatprep.subr.bf16.mxu0 %v1561_v0  ;;  %p1451_p13 = pnand %p1450_p12, %p1633_p4 }
  0x25   : > { %1362 = vmatprep.subr.bf16.mxu1 %v1561_v0  ;;  %p1458_p3 = por %p1457_p2, %p1456_p1 }
  0x26   : > { %1289 = vmatmul.mubr.msk.f32.vlgmr.msra.gmra.mrb[0].mxu0 %vm366_vm1, %v362_v20  ;;  %p1452_p0 = pneg %p1451_p13 }
  0x27   : > { %1358 = vmatpush3.bf16.msra.mxu0 %v1357_v21  ;;  %1300 = vmatmul.mubr.msk.f32.vlgmr.msra.gmra.mrb[0].mxu1 %vm366_vm1, %v363_v22 }
  0x28   : > { %1359 = vmatprep.subr.bf16.mxu0 %v1561_v0  ;;  %1364 = vmatpush3.bf16.msra.mxu1 %v1363_v23  ;;  %v361_v23 = vld [vmem:[%s1717_s14 + $0x18] sm:$0xff]  ;;  %p1459_p5 = pnand %p1458_p3, %p1452_p0 }
  0x29   : > { %1310 = vmatprep.mubr.msk.f32.mxu0 %vm1562_vm0, %v1563_v1  ;;  %1365 = vmatprep.subr.bf16.mxu1 %v1561_v0 }
  0x2a   : > { %1321 = vmatprep.mubr.msk.f32.mxu1 %vm1562_vm0, %v1563_v1 }
  0x2b   : > { %1361 = vmatpush3.bf16.msra.mxu0 %v1360_v28 }
  0x2c   : > { %1367 = vmatpush3.bf16.msra.mxu1 %v1366_v30  ;;  %1324 = vmatprep.subr.mxu0 %v1563_v1 }
  0x2d   : > { %1329 = vmatprep.subr.mxu1 %v1563_v1 }
  0x2e   : > { %1311 = vmatmul.mubr.msk.f32.vlgmr.msra.gmra.mrb[2].mxu0 %vm366_vm1, %v364_v32 }
  0x2f   : > { %1322 = vmatmul.mubr.msk.f32.vlgmr.msra.gmra.mrb[2].mxu1 %vm366_vm1, %v365_v33  ;;  %1326 = vmatprep.mubr.msk.f32.mxu0 %vm1562_vm0, %v1563_v1 }
  0x30   : > { %1331 = vmatprep.mubr.msk.f32.mxu1 %vm1562_vm0, %v1563_v1  ;;  %1325 = vmatpush3.msra.mxu0 %v358_v3 }
  0x31   : > { %1334 = vmatprep.subr.mxu0 %v1563_v1  ;;  %1330 = vmatpush3.msra.mxu1 %v359_v4 }
  0x32   : > { %1339 = vmatprep.subr.mxu1 %v1563_v1 }
  0xf9   : > { %v436_v34 = vpop.f32.mrb[0].mxu0 }
  0xfa   : > { %v1290_v35 = vpop.f32.mrb[1].mxu0  ;;  %v660_v36 = vsel %vm659_vm2, %v436_v34, -inf  ;;  %v509_v37 = vpop.f32.mrb[0].mxu1 }
  0xfb   : > { %661 = vmax.xlane.f32.xlu0 %v660_v36  ;;  %v1301_v38 = vpop.f32.mrb[1].mxu1  ;;  %v663_v39 = vsel %vm659_vm2, %v509_v37, -inf }
  0xff   : > { %664 = vmax.xlane.f32.xlu0 %v663_v39 }
 0x101   : > { %v582_v40 = vpop.f32.mrb[2].mxu0 }
 0x102   : > { %v1312_v41 = vpop.f32.mrb[3].mxu0  ;;  %v666_v42 = vsel %vm659_vm2, %v582_v40, -inf  ;;  %v655_v43 = vpop.f32.mrb[2].mxu1 }
 0x103   : > { %667 = vmax.xlane.f32.xlu1 %v666_v42  ;;  %v1323_v44 = vpop.f32.mrb[3].mxu1  ;;  %v669_v45 = vsel %vm659_vm2, %v655_v43, -inf }
 0x107   : > { %670 = vmax.xlane.f32.xlu1 %v669_v45 }
 0x188   : > { %v662_v46 = vpop.xlane.xlu0 %661 }
 0x189   : > { %v672_v47 = vsub.f32 %v436_v34, %v662_v46 }
 0x18b   : > { %v676_v48 = vmul.f32 1.442695, %v672_v47 }
 0x18c   : > { %v665_v49 = vpop.xlane.xlu0 %664 }
 0x18d   : > { %1433 = vpow2.f32 %v676_v48  ;;  %v673_v50 = vsub.f32 %v509_v37, %v665_v49 }
 0x18f   : > { %v678_v51 = vmul.f32 1.442695, %v673_v50 }
 0x190   : > { %v668_v52 = vpop.xlane.xlu1 %667 }
 0x191   : > { %1435 = vpow2.f32 %v678_v51  ;;  %v674_v53 = vsub.f32 %v582_v40, %v668_v52 }
 0x193   : > { %v680_v54 = vmul.f32 1.442695, %v674_v53 }
 0x194   : > { %v671_v55 = vpop.xlane.xlu1 %670 }
 0x195   : > { %1437 = vpow2.f32 %v680_v54  ;;  %v675_v56 = vsub.f32 %v655_v43, %v671_v55 }
 0x197   : > { %v1434_v57 = vpop.eup %1433  ;;  %v682_v58 = vmul.f32 1.442695, %v675_v56 }
 0x198   : > { %v684_v59 = vsel %vm659_vm2, %v1434_v57, 0.0 }
 0x199   : > { %1439 = vpow2.f32 %v682_v58  ;;  %685 = vadd.xlane.f32.xlu0 %v684_v59 }
 0x19b   : > { %v1436_v60 = vpop.eup %1435 }
 0x19c   : > { %v687_v61 = vsel %vm659_vm2, %v1436_v60, 0.0 }
 0x19d   : > { %688 = vadd.xlane.f32.xlu1 %v687_v61 }
 0x19f   : > { %v1438_v62 = vpop.eup %1437 }
 0x1a0   : > { %v690_v63 = vsel %vm659_vm2, %v1438_v62, 0.0 }
 0x1a1   : > { %691 = vadd.xlane.f32.xlu0 %v690_v63 }
 0x1a3   : > { %v1440_v0 = vpop.eup %1439 }
 0x1a4   : > { %v693_v2 = vsel %vm659_vm2, %v1440_v0, 0.0 }
 0x1a5   : > { %694 = vadd.xlane.f32.xlu1 %v693_v2 }
 0x226   : > { %v686_v5 = vpop.xlane.xlu0 %685 }
 0x227   : > { %1441 = vrcp.f32 %v686_v5 }
 0x22a   : > { %v689_v6 = vpop.xlane.xlu1 %688 }
 0x22b   : > { %1443 = vrcp.f32 %v689_v6 }
 0x22e   : > { %v692_v7 = vpop.xlane.xlu0 %691 }
 0x22f   : > { %1445 = vrcp.f32 %v692_v7 }
 0x231   : > { %v1442_v8 = vpop.eup %1441 }
 0x232   : > { %v700_v9 = vmul.f32 %v1442_v8, %v686_v5  ;;  %v695_v10 = vpop.xlane.xlu1 %694 }
 0x233   : > { %1447 = vrcp.f32 %v695_v10 }
 0x234   : > { %v704_v11 = vsub.f32 2.0, %v700_v9 }
 0x235   : > { %v1444_v12 = vpop.eup %1443 }
 0x236   : > { %v708_v13 = vmul.f32 %v1442_v8, %v704_v11  ;;  %v701_v14 = vmul.f32 %v1444_v12, %v689_v6 }
 0x238   : > { %v712_v15 = vmul.f32 %v1434_v57, %v708_v13  ;;  %v705_v16 = vsub.f32 2.0, %v701_v14 }
 0x239   : > { %v1446_v18 = vpop.eup %1445 }
 0x23a   : > { %v709_v19 = vmul.f32 %v1444_v12, %v705_v16  ;;  %v702_v20 = vmul.f32 %v1446_v18, %v692_v7  ;;  %1327 = vmatmul.mubr.msk.f32.vlgmr.msra.gmra.mrb[4].mxu0 %vm659_vm2, %v712_v15  ;;  %716 = vst.msk [vmem:[%s301_s24] sm:$0xff] %vm659_vm2, %v712_v15 }
 0x23b   : > { %1335 = vmatpush3.msra.mxu0 %v360_v17  ;;  %1336 = vmatprep.mubr.msk.f32.mxu0 %vm1562_vm0, %v1563_v1 }
 0x23c   : > { %v713_v21 = vmul.f32 %v1436_v60, %v709_v19  ;;  %v706_v22 = vsub.f32 2.0, %v702_v20 }
 0x23d   : > { %v1448_v24 = vpop.eup %1447 }
 0x23e   : > { %v710_v25 = vmul.f32 %v1446_v18, %v706_v22  ;;  %v703_v26 = vmul.f32 %v1448_v24, %v695_v10  ;;  %1332 = vmatmul.mubr.msk.f32.vlgmr.msra.gmra.mrb[4].mxu1 %vm659_vm2, %v713_v21  ;;  %717 = vst.msk [vmem:[%s301_s24 + $0x8] sm:$0xff] %vm659_vm2, %v713_v21 }
 0x23f   : > { %1340 = vmatpush3.msra.mxu1 %v361_v23  ;;  %1341 = vmatprep.mubr.msk.f32.mxu1 %vm1562_vm0, %v1563_v1 }
 0x240   : > { %v714_v27 = vmul.f32 %v1438_v62, %v710_v25  ;;  %v707_v28 = vsub.f32 2.0, %v703_v26 }
 0x242   : > { %v711_v29 = vmul.f32 %v1448_v24, %v707_v28  ;;  %1337 = vmatmul.mubr.msk.f32.vlgmr.msra.gmra.mrb[6].mxu0 %vm659_vm2, %v714_v27  ;;  %718 = vst.msk [vmem:[%s301_s24 + $0x10] sm:$0xff] %vm659_vm2, %v714_v27 }
 0x244   : > { %v715_v30 = vmul.f32 %v1440_v0, %v711_v29 }
 0x246   : > { %1342 = vmatmul.mubr.msk.f32.vlgmr.msra.gmra.mrb[6].mxu1 %vm659_vm2, %v715_v30  ;;  %719 = vst.msk [vmem:[%s301_s24 + $0x18] sm:$0xff] %vm659_vm2, %v715_v30 }
 0x247   : > { %1462 = shalt.err (!%p1459_p5)
}
 0x248   : > { %s1463_s12 = scalar_lea.hbm %s1751_s6, 512  ;;  %s1467_s24 = scalar_lea.hbm %s1848_s4, 1024 }
 0x249   : > { %p1464_p6 = scmp.ne.s32.totalorder %s1751_s6, %s1463_s12  ;;  %p1468_p10 = scmp.lt.u32.totalorder %s1751_s6, %s1848_s4 }
 0x24a   : > { %p1469_p11 = scmp.lt.u32.totalorder %s1467_s24, %s1463_s12  ;;  %p1471_p13 = scmp.lt.u32.totalorder %s1463_s12, %s1751_s6 }
 0x24b   : > { %p1465_p7 = pnand %p1464_p6, %p1633_p4 }
 0x24c   : > { %p1470_p12 = por %p1469_p11, %p1468_p10 }
 0x24d   : > { %p1466_p9 = pneg %p1465_p7 }
 0x24e   : > { %p1472_p0 = por %p1471_p13, %p1470_p12 }
 0x250   : > { %p1473_p1 = pnand %p1472_p0, %p1466_p9 }
 0x252   : > { %1476 = shalt.err (!%p1473_p1)
}
 0x253   : > { %s1565_s8 = smov 128   ;;  %s1566_s9 = smov 8  }
 0x254   : > { %1369 = dma.vmem_to_hbm [thread:$0]  (%p1633_p4), %s1743_s26, 512, %s1751_s6, %s1022_s7, %s1565_s8, %s1565_s8, %s1566_s9  }
 0x255   : > { %s294_s10 = scalar_lea.vmem [#allocation2], %s1223_s22  ;;  %s1792_s22 = scalar_lea.hbm %s1847_s3, %s1250_s29 }
 0x256   : > { %s1038_s11 = sshll.u32 %s294_s10, 4  ;;  %s1017_s7 = scalar_lea.sflag [#allocation3], %s1724_s21  ;;  %s1785_s11 = int_to_ptr.vmem [resolvable:$true] %s1038_s11 }
 0x257   : > { %s1477_s12 = scalar_lea.vmem %s1785_s11, 512  ;;  %s1567_s13 = smov [#allocation2]  }
 0x258   : > { %p1478_p2 = scmp.ne.s32.totalorder %s1785_s11, %s1477_s12  ;;  %s1481_s18 = sshll.u32 %s1567_s13, 4  ;;  %s1482_s18 = int_to_ptr.vmem [resolvable:$false] %s1481_s18 }
 0x259   : > { %s1483_s14 = scalar_lea.vmem %s1482_s18, 1024  ;;  %p1484_p6 = scmp.lt.s32.totalorder %s1785_s11, %s1482_s18 }
 0x25a   : > { %p1479_p3 = pnand %p1478_p2, %p1633_p4  ;;  %p1485_p7 = scmp.lt.s32.totalorder %s1483_s14, %s1477_s12 }
 0x25c   : > { %p1480_p5 = pneg %p1479_p3  ;;  %p1486_p9 = por %p1485_p7, %p1484_p6 }
 0x25e   : > { %p1487_p10 = pnand %p1486_p9, %p1480_p5 }
 0x30d   : > { %v789_v1 = vpop.f32.mrb[4].mxu0 }
 0x30e   : > { %1012 = vst.msk [vmem:[%s294_s10] sm:$0xff] %vm366_vm1, %v789_v1  ;;  %v1328_v31 = vpop.f32.mrb[5].mxu0 }
 0x311   : > { %v862_v32 = vpop.f32.mrb[4].mxu1 }
 0x312   : > { %1013 = vst.msk [vmem:[%s294_s10 + $0x8] sm:$0xff] %vm366_vm1, %v862_v32  ;;  %v1333_v33 = vpop.f32.mrb[5].mxu1 }
 0x315   : > { %v935_v34 = vpop.f32.mrb[6].mxu0 }
 0x316   : > { %1014 = vst.msk [vmem:[%s294_s10 + $0x10] sm:$0xff] %vm366_vm1, %v935_v34  ;;  %v1338_v35 = vpop.f32.mrb[7].mxu0 }
 0x319   : > { %v1008_v36 = vpop.f32.mrb[6].mxu1 }
 0x31a   : > { %1015 = vst.msk [vmem:[%s294_s10 + $0x18] sm:$0xff] %vm366_vm1, %v1008_v36  ;;  %v1343_v37 = vpop.f32.mrb[7].mxu1 }
 0x31b   : > { %1490 = shalt.err (!%p1487_p10)
}
 0x31c   : > { %s1491_s29 = scalar_lea.hbm %s1792_s22, 512  ;;  %s1495_s5 = scalar_lea.hbm %s1847_s3, 1024 }
 0x31d   : > { %p1492_p11 = scmp.ne.s32.totalorder %s1792_s22, %s1491_s29  ;;  %p1496_p0 = scmp.lt.u32.totalorder %s1792_s22, %s1847_s3 }
 0x31e   : > { %p1497_p1 = scmp.lt.u32.totalorder %s1495_s5, %s1491_s29  ;;  %p1499_p3 = scmp.lt.u32.totalorder %s1491_s29, %s1792_s22 }
 0x31f   : > { %p1493_p12 = pnand %p1492_p11, %p1633_p4 }
 0x320   : > { %p1498_p2 = por %p1497_p1, %p1496_p0 }
 0x321   : > { %p1494_p13 = pneg %p1493_p12 }
 0x322   : > { %p1500_p5 = por %p1499_p3, %p1498_p2 }
 0x324   : > { %p1501_p6 = pnand %p1500_p5, %p1494_p13 }
 0x326   : > { %1504 = shalt.err (!%p1501_p6)
}
 0x327   : > { %1368 = dma.vmem_to_hbm [thread:$0]  (%p1633_p4), %s1785_s11, 512, %s1792_s22, %s1017_s7, %s1565_s8, %s1565_s8, %s1566_s9  }
 0x328 PF: > { %p1379_p7 = scmp.ge.s32.totalorder %s1559_s20, 2  ;;  %s1072_s6 = sand.u32 1, %s1539_s15  }
 0x329   : > { %s1073_s12 = scalar_lea.sflag [#allocation3], %s1072_s6 }
 0x32a   : > { %p1373_p9 = pnand %p1379_p7, %p1640_p8 }
 0x32c   : > { %1530 = dma.done.wait (!%p1373_p9), %s1073_s12, 512  }
 0x32d   : > { %1532 = vsyncadd (!%p1373_p9), %s1073_s12, 4294966784  ;;  %s1082_s25 = scalar_lea.sflag [#allocation5], %s1072_s6 }
 0x32e   : > { %1534 = dma.done.wait (!%p1373_p9), %s1082_s25, 512  }
 0x32f   : > { %1536 = vsyncadd (!%p1373_p9), %s1082_s25, 4294966784  ;;  %s21_s20 = sadd.s32 1, %s1559_s20   ;;  %s1851_s15 = smov %s1543_s16 }
 0x330   : > { %p18_p10 = scmp.ge.s32.totalorder %s21_s20, 4   ;;  %s1852_s16 = smov %s1547_s17 }
 0x331   : > { %s1853_s17 = smov %s1646_s28  ;;  %s1854_s18 = smov %s1555_s19 }
 0x332   : > { %s1855_s19 = smov %s1857_s23  ;;  %20 = sbr.rel (!%p18_p10) target bundleno = 6 (0x6), region = 90 }
 0x339   :  { %1087 = vsyncpa [#allocation3], 1 }
 0x33a   :  { %1089 = vsyncpa [#allocation3 + $0x1], 1 }
 0x33b   :  { %1090 = vsyncpa [#allocation5], 1 }
 0x33c   :  { %1092 = vsyncpa [#allocation5 + $0x1], 1 }

</bundles_post_ra>
